<compile_context>
chip_gen: v5e
topology: v5e:2x2
jax: 0.10.0
libtpu: 0.0.40
codegen_flags: <defaults>
</compile_context>

<pallas_src>
import functools

import jax
import jax.numpy as jnp
from jax.experimental import pallas as pl
from jax.experimental.pallas import tpu as pltpu

GROUPS = 6
LAMBDA = 0.01
EPS = 1e-5
SUBLANE = 8


def _round_up(v, m):
    return ((v + m - 1) // m) * m


def _vmem_limit_bytes():
    """Generation-aware scoped-VMEM limit: half of physical (32 MiB on v7x, 64 MiB on v5e/v6e)."""
    try:
        phys = int(pltpu.get_tpu_info().vmem_capacity_bytes)
    except Exception:
        phys = 64 * 1024 * 1024
    return int(min(phys // 2, 100 * 1024 * 1024))


def _num_tensorcores():
    """Best-effort TensorCore count (2 on v7x); used only to gate the fused-path cutoff."""
    try:
        return max(1, int(getattr(jax.devices()[0], "num_cores", 1) or 1))
    except Exception:
        return 1


def _linear_softmax(x, w1, b1, w2):
    """y = x @ W1 + b1 ; s = softmax(y @ W2, axis=-1)."""
    y = jnp.dot(x, w1, preferred_element_type=jnp.float32) + b1
    logits = jnp.dot(y, w2, preferred_element_type=jnp.float32)
    m = jnp.max(logits, axis=-1, keepdims=True)
    e = jnp.exp(logits - m)
    # EUP approximate reciprocal; its error only reaches the output through the
    # LAMBDA = 0.01 scaled branch, well inside tolerance.
    s = e * pl.reciprocal(jnp.sum(e, axis=-1, keepdims=True), approx=True)
    return y, s


def _group_moments(sm, ym):
    """MXU-collapsed BN moments: S1 = s^T y, S2 = (s*s)^T (y*y), both [G, F].

    s is transposed once (single XLU transpose) and reused by both matmuls in
    native A[m,k] @ B[k,n] form.
    """
    st = jnp.transpose(sm)                                        # [G, rows]
    s1 = jnp.dot(st, ym, preferred_element_type=jnp.float32)      # [G, F]
    s2 = jnp.dot(st * st, ym * ym, preferred_element_type=jnp.float32)
    return s1, s2


def fused_kernel(x_ref, w1_ref, b1_ref, w2_ref, gamma_ref, beta_ref, o_ref):
    """Small/moderate-N path: whole batch resident in VMEM, stats + normalize fused."""
    x = x_ref[...]
    n_rows = x_ref.shape[0]                          # exact (no row padding on this path)
    y, s = _linear_softmax(x, w1_ref[...], b1_ref[...], w2_ref[...])
    s1, s2 = _group_moments(s, y)
    inv_n = 1.0 / n_rows
    mean = s1 * inv_n                                # [G, F]
    var = jnp.maximum(s2 * inv_n - mean * mean, 0.0)
    a = gamma_ref[...] * jax.lax.rsqrt(var + EPS)    # gamma * inv_std   [G, F]
    c = jnp.sum(beta_ref[...] - mean * a, axis=0, keepdims=True)  # [1, F]
    agg = y * jnp.dot(s, a, preferred_element_type=jnp.float32) + c  # sum_g normed_g
    z = y + LAMBDA * agg
    o_ref[...] = z * jax.nn.sigmoid(z)               # SiLU (precise: not lambda-damped)


def stats_kernel(x_ref, w1_ref, b1_ref, w2_ref, s1_ref, s2_ref, *, n_rows):
    """Gridded pass 1: per-row-tile partial BN moments [G, F] (row axis parallel)."""
    i = pl.program_id(0)
    x = x_ref[...]
    y, s = _linear_softmax(x, w1_ref[...], b1_ref[...], w2_ref[...])
    row0 = i * x_ref.shape[0]
    # Boundary-block tail rows hold unspecified data: mask BOTH s and y so the
    # moment matmuls see exact zeros (0 * garbage would be NaN otherwise).
    sm = jnp.where(row0 + jax.lax.broadcasted_iota(jnp.int32, s.shape, 0) < n_rows, s, 0.0)
    ym = jnp.where(row0 + jax.lax.broadcasted_iota(jnp.int32, y.shape, 0) < n_rows, y, 0.0)
    s1, s2 = _group_moments(sm, ym)
    s1_ref[0] = s1
    s2_ref[0] = s2


def apply_kernel(x_ref, w1_ref, b1_ref, w2_ref, a_ref, c_ref, o_ref):
    """Gridded pass 2: recompute y/s per tile, apply collapsed norm + SiLU."""
    x = x_ref[...]
    y, s = _linear_softmax(x, w1_ref[...], b1_ref[...], w2_ref[...])
    agg = y * jnp.dot(s, a_ref[...], preferred_element_type=jnp.float32) + c_ref[...]
    z = y + LAMBDA * agg
    o_ref[...] = z * jax.nn.sigmoid(z)   # out-of-range tail rows are not written back


def embedding_layer(x, w1, b1, w2, gamma, beta, *, block_rows=4096, fused_rows=None):
    """Linear -> DiffGroupNorm(6, training-mode batch stats) -> SiLU."""
    n, din = x.shape
    f = w1.shape[1]
    g = w2.shape[1]

    vmem_limit = _vmem_limit_bytes()
    num_tc = _num_tensorcores()

    # Approximate resident f32 bytes per row (x, y, s, output, intermediates).
    bytes_per_row = 4 * (din + 4 * f + 2 * g)

    if fused_rows is None:
        fused_rows = int(min(16384, (vmem_limit // 2) // bytes_per_row))
        fused_rows = max(fused_rows, 8 * SUBLANE)
        if num_tc >= 2:
            # v7x: leave larger N to the gridded path so the parallel row axis
            # shards across both TensorCores instead of serializing on one.
            fused_rows = min(fused_rows, 2048)

    if n <= fused_rows:
        # Fixed-overhead regime: single un-gridded invocation, everything resident,
        # no row padding and no output slicing.
        return pl.pallas_call(
            fused_kernel,
            out_shape=jax.ShapeDtypeStruct((n, f), jnp.float32),
            in_specs=[pl.BlockSpec(memory_space=pltpu.MemorySpace.VMEM)] * 6,
            out_specs=pl.BlockSpec(memory_space=pltpu.MemorySpace.VMEM),
            compiler_params=pltpu.CompilerParams(vmem_limit_bytes=vmem_limit),
        )(x, w1, b1, w2, gamma, beta)

    # ---- Two-pass gridded path (BN stats are global over N). ----
    # Pass 1 emits per-tile partial moments (row axis fully parallel -> megacore
    # friendly), a tiny [G, F] XLA finalize produces gamma*inv_std and the bias
    # term, pass 2 normalizes.  Large row tiles keep the per-step ~0.35 us fixed
    # overhead negligible while still using only a few MiB of VMEM per step.
    tn = min(_round_up(block_rows, SUBLANE), _round_up(n, SUBLANE))
    if num_tc >= 2:
        tn = min(tn, max(SUBLANE, _round_up(pl.cdiv(n, 2), SUBLANE)))  # keep r >= 2
    # Safety clamp so x/out double-buffers stay well inside the scoped VMEM limit.
    tn = min(tn, max(SUBLANE, _round_up((vmem_limit // 4) // bytes_per_row, SUBLANE)))
    r = pl.cdiv(n, tn)

    cparams = pltpu.CompilerParams(
        dimension_semantics=("parallel",),
        vmem_limit_bytes=vmem_limit,
    )

    s1_part, s2_part = pl.pallas_call(
        functools.partial(stats_kernel, n_rows=n),
        out_shape=(jax.ShapeDtypeStruct((r, g, f), jnp.float32),
                   jax.ShapeDtypeStruct((r, g, f), jnp.float32)),
        grid_spec=pltpu.PrefetchScalarGridSpec(
            num_scalar_prefetch=0,
            grid=(r,),
            in_specs=[pl.BlockSpec((tn, din), lambda i: (i, 0)),   # x tile
                      pl.BlockSpec((din, f), lambda i: (0, 0)),    # W1 (resident)
                      pl.BlockSpec((1, f), lambda i: (0, 0)),      # b1 (resident)
                      pl.BlockSpec((f, g), lambda i: (0, 0))],     # W2 (resident)
            out_specs=(pl.BlockSpec((1, g, f), lambda i: (i, 0, 0)),
                       pl.BlockSpec((1, g, f), lambda i: (i, 0, 0))),
        ),
        compiler_params=cparams,
    )(x, w1, b1, w2)

    inv_n = 1.0 / n
    mean = jnp.sum(s1_part, axis=0) * inv_n                   # [G, F]
    var = jnp.maximum(jnp.sum(s2_part, axis=0) * inv_n - mean * mean, 0.0)
    a = gamma * jax.lax.rsqrt(var + EPS)                      # gamma * inv_std
    c = jnp.sum(beta - mean * a, axis=0, keepdims=True)       # [1, F]

    return pl.pallas_call(
        apply_kernel,
        out_shape=jax.ShapeDtypeStruct((n, f), jnp.float32),
        grid_spec=pltpu.PrefetchScalarGridSpec(
            num_scalar_prefetch=0,
            grid=(r,),
            in_specs=[pl.BlockSpec((tn, din), lambda i: (i, 0)),
                      pl.BlockSpec((din, f), lambda i: (0, 0)),
                      pl.BlockSpec((1, f), lambda i: (0, 0)),
                      pl.BlockSpec((f, g), lambda i: (0, 0)),
                      pl.BlockSpec((g, f), lambda i: (0, 0)),    # gamma*inv_std
                      pl.BlockSpec((1, f), lambda i: (0, 0))],   # bias term c
            out_specs=pl.BlockSpec((tn, f), lambda i: (i, 0)),
        ),
        compiler_params=cparams,
    )(x, w1, b1, w2, a, c)


def reference(x, w1, b1, w2, gamma, beta):
    """Pure-JAX reference mirroring the PyTorch forward (training-mode BN)."""
    y = x @ w1 + b1
    s = jax.nn.softmax(y @ w2, axis=-1)                  # [N, G]
    out = s[:, :, None] * y[:, None, :]                  # [N, G, F]
    mean = out.mean(axis=0, keepdims=True)
    var = ((out - mean) ** 2).mean(axis=0, keepdims=True)
    normed = (out - mean) / jnp.sqrt(var + EPS)
    normed = normed * gamma[None] + beta[None]
    z = y + LAMBDA * normed.sum(axis=1)
    return z * jax.nn.sigmoid(z)


if __name__ == "__main__":
    DIN, DOUT = 16, 32  # input_features, output_features

    key = jax.random.PRNGKey(0)
    kx, kw1, kb1, kw2, kx2 = jax.random.split(key, 5)

    # Linear(input_features, output_features): PyTorch-style uniform init.
    bound1 = 1.0 / (DIN ** 0.5)
    w1 = jax.random.uniform(kw1, (DIN, DOUT), jnp.float32, -bound1, bound1)
    b1 = jax.random.uniform(kb1, (1, DOUT), jnp.float32, -bound1, bound1)
    # DiffGroupNorm assignment Linear(output_features, groups), no bias.
    bound2 = 1.0 / (DOUT ** 0.5)
    w2 = jax.random.uniform(kw2, (DOUT, GROUPS), jnp.float32, -bound2, bound2)
    # BatchNorm1d(groups * output_features) affine params, fresh init.
    gamma = jnp.ones((GROUPS, DOUT), dtype=jnp.float32)
    beta = jnp.zeros((GROUPS, DOUT), dtype=jnp.float32)

    embed = jax.jit(embedding_layer, static_argnames=("block_rows", "fused_rows"))

    # --- small shape: fused single-call path ---
    x = jax.random.normal(kx, (8, DIN), dtype=jnp.float32)
    out = embed(x, w1, b1, w2, gamma, beta)
    jax.block_until_ready(out)
    ref = reference(x, w1, b1, w2, gamma, beta)
    assert out.shape == (8, DOUT)
    assert jnp.allclose(out, ref, rtol=5e-4, atol=5e-4), "mismatch vs JAX reference (fused path)"

    # --- larger N, forced onto the gridded two-pass path (r=3, boundary-block masking) ---
    x2 = jax.random.normal(kx2, (300, DIN), dtype=jnp.float32)
    out2 = embed(x2, w1, b1, w2, gamma, beta, block_rows=128, fused_rows=128)
    jax.block_until_ready(out2)
    ref2 = reference(x2, w1, b1, w2, gamma, beta)
    assert out2.shape == (300, DOUT)
    assert jnp.allclose(out2, ref2, rtol=5e-4, atol=5e-4), "mismatch vs JAX reference (grid path)"

    print("KERNEL_OK")
</pallas_src>

<mosaic_0001>
module attributes {stable_mosaic.version = 11 : i64} {
  func.func @fused_kernel(%arg0: memref<8x16xf32, #tpu.memory_space<vmem>>, %arg1: memref<16x32xf32, #tpu.memory_space<vmem>>, %arg2: memref<1x32xf32, #tpu.memory_space<vmem>>, %arg3: memref<32x6xf32, #tpu.memory_space<vmem>>, %arg4: memref<6x32xf32, #tpu.memory_space<vmem>>, %arg5: memref<6x32xf32, #tpu.memory_space<vmem>>, %arg6: memref<8x32xf32, #tpu.memory_space<vmem>>) attributes {dimension_semantics = [], scalar_prefetch = 0 : i64, scratch_operands = 0 : i64, tpu.core_type = #tpu.core_type<tc>} {
    %c0 = arith.constant 0 : index
    %c0_0 = arith.constant 0 : index
    %0 = vector.load %arg0[%c0, %c0_0] : memref<8x16xf32, #tpu.memory_space<vmem>>, vector<8x16xf32>
    %c0_1 = arith.constant 0 : index
    %c0_2 = arith.constant 0 : index
    %1 = vector.load %arg1[%c0_1, %c0_2] : memref<16x32xf32, #tpu.memory_space<vmem>>, vector<16x32xf32>
    %c0_3 = arith.constant 0 : index
    %c0_4 = arith.constant 0 : index
    %2 = vector.load %arg2[%c0_3, %c0_4] : memref<1x32xf32, #tpu.memory_space<vmem>>, vector<1x32xf32>
    %c0_5 = arith.constant 0 : index
    %c0_6 = arith.constant 0 : index
    %3 = vector.load %arg3[%c0_5, %c0_6] : memref<32x6xf32, #tpu.memory_space<vmem>>, vector<32x6xf32>
    %cst = arith.constant dense<0.000000e+00> : vector<8x32xf32>
    %4 = tpu.matmul %0, %1, %cst {dimension_numbers = #tpu.dot_dimension_numbers<[1], [0], [0], [1], [0, 0, 1, 1], [], []>} : vector<8x16xf32>, vector<16x32xf32>, vector<8x32xf32> -> vector<8x32xf32>
    %5 = vector.broadcast %2 : vector<1x32xf32> to vector<8x32xf32>
    %6 = arith.addf %4, %5 : vector<8x32xf32>
    %cst_7 = arith.constant dense<0.000000e+00> : vector<8x6xf32>
    %7 = tpu.matmul %6, %3, %cst_7 {dimension_numbers = #tpu.dot_dimension_numbers<[1], [0], [0], [1], [0, 0, 1, 1], [], []>} : vector<8x32xf32>, vector<32x6xf32>, vector<8x6xf32> -> vector<8x6xf32>
    %cst_8 = arith.constant dense<0xFF800000> : vector<8xf32>
    %8 = vector.multi_reduction <maximumf>, %7, %cst_8 [1] : vector<8x6xf32> to vector<8xf32>
    %9 = vector.shape_cast %8 : vector<8xf32> to vector<8x1xf32>
    %10 = vector.broadcast %9 : vector<8x1xf32> to vector<8x6xf32>
    %11 = arith.subf %7, %10 : vector<8x6xf32>
    %12 = math.exp %11 : vector<8x6xf32>
    %cst_9 = arith.constant dense<0.000000e+00> : vector<8xf32>
    %13 = vector.multi_reduction <add>, %12, %cst_9 [1] : vector<8x6xf32> to vector<8xf32>
    %14 = vector.shape_cast %13 : vector<8xf32> to vector<8x1xf32>
    %15 = tpu.reciprocal %14 {approx = true} : vector<8x1xf32> -> vector<8x1xf32>
    %16 = vector.broadcast %15 : vector<8x1xf32> to vector<8x6xf32>
    %17 = arith.mulf %12, %16 : vector<8x6xf32>
    %18 = tpu.transpose %17, [1, 0] : vector<8x6xf32> -> vector<6x8xf32>
    %cst_10 = arith.constant dense<0.000000e+00> : vector<6x32xf32>
    %19 = tpu.matmul %18, %6, %cst_10 {dimension_numbers = #tpu.dot_dimension_numbers<[1], [0], [0], [1], [0, 0, 1, 1], [], []>} : vector<6x8xf32>, vector<8x32xf32>, vector<6x32xf32> -> vector<6x32xf32>
    %20 = arith.mulf %18, %18 : vector<6x8xf32>
    %21 = arith.mulf %6, %6 : vector<8x32xf32>
    %cst_11 = arith.constant dense<0.000000e+00> : vector<6x32xf32>
    %22 = tpu.matmul %20, %21, %cst_11 {dimension_numbers = #tpu.dot_dimension_numbers<[1], [0], [0], [1], [0, 0, 1, 1], [], []>} : vector<6x8xf32>, vector<8x32xf32>, vector<6x32xf32> -> vector<6x32xf32>
    %cst_12 = arith.constant 1.250000e-01 : f32
    %23 = vector.broadcast %cst_12 : f32 to vector<6x32xf32>
    %24 = arith.mulf %19, %23 : vector<6x32xf32>
    %cst_13 = arith.constant 1.250000e-01 : f32
    %25 = vector.broadcast %cst_13 : f32 to vector<6x32xf32>
    %26 = arith.mulf %22, %25 : vector<6x32xf32>
    %27 = arith.mulf %24, %24 : vector<6x32xf32>
    %28 = arith.subf %26, %27 : vector<6x32xf32>
    %cst_14 = arith.constant 0.000000e+00 : f32
    %29 = vector.broadcast %cst_14 : f32 to vector<6x32xf32>
    %30 = arith.maximumf %28, %29 : vector<6x32xf32>
    %c0_15 = arith.constant 0 : index
    %c0_16 = arith.constant 0 : index
    %31 = vector.load %arg4[%c0_15, %c0_16] : memref<6x32xf32, #tpu.memory_space<vmem>>, vector<6x32xf32>
    %cst_17 = arith.constant 9.99999974E-6 : f32
    %32 = vector.broadcast %cst_17 : f32 to vector<6x32xf32>
    %33 = arith.addf %30, %32 : vector<6x32xf32>
    %34 = math.rsqrt %33 : vector<6x32xf32>
    %35 = arith.mulf %31, %34 : vector<6x32xf32>
    %c0_18 = arith.constant 0 : index
    %c0_19 = arith.constant 0 : index
    %36 = vector.load %arg5[%c0_18, %c0_19] : memref<6x32xf32, #tpu.memory_space<vmem>>, vector<6x32xf32>
    %37 = arith.mulf %24, %35 : vector<6x32xf32>
    %38 = arith.subf %36, %37 : vector<6x32xf32>
    %cst_20 = arith.constant dense<0.000000e+00> : vector<32xf32>
    %39 = vector.multi_reduction <add>, %38, %cst_20 [0] : vector<6x32xf32> to vector<32xf32>
    %40 = vector.shape_cast %39 : vector<32xf32> to vector<1x32xf32>
    %cst_21 = arith.constant dense<0.000000e+00> : vector<8x32xf32>
    %41 = tpu.matmul %17, %35, %cst_21 {dimension_numbers = #tpu.dot_dimension_numbers<[1], [0], [0], [1], [0, 0, 1, 1], [], []>} : vector<8x6xf32>, vector<6x32xf32>, vector<8x32xf32> -> vector<8x32xf32>
    %42 = arith.mulf %6, %41 : vector<8x32xf32>
    %43 = vector.broadcast %40 : vector<1x32xf32> to vector<8x32xf32>
    %44 = arith.addf %42, %43 : vector<8x32xf32>
    %cst_22 = arith.constant 0.00999999977 : f32
    %45 = vector.broadcast %cst_22 : f32 to vector<8x32xf32>
    %46 = arith.mulf %45, %44 : vector<8x32xf32>
    %47 = arith.addf %6, %46 : vector<8x32xf32>
    %48 = arith.negf %47 : vector<8x32xf32>
    %49 = math.exp %48 : vector<8x32xf32>
    %cst_23 = arith.constant 1.000000e+00 : f32
    %50 = vector.broadcast %cst_23 : f32 to vector<8x32xf32>
    %51 = arith.addf %50, %49 : vector<8x32xf32>
    %52 = arith.divf %50, %51 : vector<8x32xf32>
    %53 = arith.mulf %47, %52 : vector<8x32xf32>
    %c0_24 = arith.constant 0 : index
    %c0_25 = arith.constant 0 : index
    %54 = vector.load %arg6[%c0_24, %c0_25] : memref<8x32xf32, #tpu.memory_space<vmem>>, vector<8x32xf32>
    tpu.vector_store %arg6[%c0_24, %c0_25], %53 {strides = array<i32>} : memref<8x32xf32, #tpu.memory_space<vmem>>, vector<8x32xf32>,
    return
  }
}

</mosaic_0001>

<bundles_post_ra>
// kernel: embedding_layer.1
= control target key start
LH: loop header
LB: loop body
LE: loop exit
PB: predicated region body
PF: predicated region fallthrough
CT: control target
= control target key end

     0   :  { %vm35_vm0 = vcmask 130048   ;;  %s401_s0 = inlined_call_operand.vmem [shape: f32[8,16], index: 0, kind: input, shape index: {}]   ;;  %s402_s1 = inlined_call_operand.vmem [shape: f32[16,32], index: 1, kind: input, shape index: {}]   ;;  %s403_s2 = inlined_call_operand.vmem [shape: f32[1,32], index: 2, kind: input, shape index: {}]   ;;  %s404_s3 = inlined_call_operand.vmem [shape: f32[32,6], index: 3, kind: input, shape index: {}]   ;;  %s405_s4 = inlined_call_operand.vmem [shape: f32[6,32], index: 4, kind: input, shape index: {}]   ;;  %s406_s5 = inlined_call_operand.vmem [shape: f32[6,32], index: 5, kind: input, shape index: {}]   ;;  %s407_s6 = inlined_call_operand.hbm [shape: f32[8,32], index: 6, kind: output, shape index: {}]  }
   0x1   :  { %v26_v0 = vld [vmem:[%s402_s1 + $0x8] sm:$0xff]  ;;  %v25_v1 = vld [vmem:[%s402_s1] sm:$0xff]  ;;  %v31_v3 = vld [vmem:[%s404_s3 + $0x18] sm:$0xff] }
   0x2   :  { %v24_v2 = vld [vmem:[%s401_s0] sm:$0xff]  ;;  %53 = vmatpush.msra.mxu0 %v26_v0  ;;  %v30_v4 = vld [vmem:[%s404_s3 + $0x10] sm:$0xff]  ;;  %75 = vmatpush.msra.mxu1 %v31_v3 }
   0x3   :  { %11 = vsyncpa [#allocation3], 0  ;;  %v29_v5 = vld [vmem:[%s404_s3 + $0x8] sm:$0xff]  ;;  %v28_v6 = vld [vmem:[%s404_s3] sm:$0xff]  ;;  %vm59_vm1 = vcmask 261120   ;;  %vm83_vm2 = vcmask 48128  }
   0x4   :  { %54 = vmatpush.msra.mxu0 %v25_v1  ;;  %76 = vmatpush.msra.mxu1 %v30_v4  ;;  %v282_v7 = vld [vmem:[%s403_s2] ss:$0 sm:$0xff]  ;;  %vm127_vm3 = vcmask 64512   ;;  %vm208_vm7 = vcmask 1045504   ;;  %vm197_vm8 = vcmask 259072   ;;  %s264_s15 = sshll.u32 %s407_s6, 4  ;;  %s265_s15 = int_to_ptr.hbm [resolvable:$true] %s264_s15 }
   0x5   :  { %273 = vmatmul.msk.f32.vlgmr.msra.gmra.mxu0 %vm35_vm0, %v24_v2  ;;  %v181_v36 = vld [vmem:[%s405_s4] sm:$0x3f]  ;;  %s319_s4 = smov [#allocation2]  }
   0x6   :  { %77 = vmatpush.msra.mxu1 %v29_v5  ;;  %v194_v41 = vld [vmem:[%s406_s5] sm:$0x3f]  ;;  %s262_s5 = sshll.u32 %s319_s4, 4  ;;  %s263_s5 = int_to_ptr.vmem [resolvable:$true] %s262_s5 }
   0x8   :  { %78 = vmatpush.msra.mxu1 %v28_v6 }
  0x82   :  { %v56_v8 = vpop.f32.mrf.mxu0 }
  0x83   :  { %v379_v9 = vadd.f32 %v282_v7, %v56_v8 }
  0x85   :  { %274 = vmatmul.msk.f32.vlgmr.msra.gmra.mxu1 %vm59_vm1, %v379_v9  ;;  %146 = vmatpush.msra.mxu2 %v379_v9  ;;  %v152_v10 = vmul.f32 %v379_v9, %v379_v9 }
  0x87   :  { %171 = vmatpush.msra.mxu3 %v152_v10 }
 0x102   :  { %v80_v11 = vpop.f32.mrf.mxu1 }
 0x103   :  { %v84_v12 = vsel %vm83_vm2, %v80_v11, -inf }
 0x104   :  { %85 = vmax.xlane.f32.xlu0 %v84_v12 }
 0x177   :  { %v86_v13 = vpop.xlane.xlu0 %85 }
 0x178   :  { %v87_v14 = vsub.f32 %v80_v11, %v86_v13 }
 0x17a   :  { %v88_v15 = vmul.f32 1.442695, %v87_v14 }
 0x17c   :  { %283 = vpow2.f32 %v88_v15 }
 0x182   :  { %v284_v16 = vpop.eup %283 }
 0x183   :  { %v90_v17 = vsel %vm83_vm2, %v284_v16, 0.0 }
 0x184   :  { %91 = vadd.xlane.f32.xlu0 %v90_v17 }
 0x1f7   :  { %v92_v18 = vpop.xlane.xlu0 %91 }
 0x1f8   :  { %285 = vrcp.f32 %v92_v18 }
 0x1fe   :  { %v286_v19 = vpop.eup %285 }
 0x1ff   :  { %v94_v20 = vmul.f32 %v286_v19, %v284_v16 }
 0x201   :  { %95 = vxpose.xlu1.b32.start.end [1/1] (short) (narrow) %v94_v20, 8 }
 0x2a5   :  { %v111_v21 = vpop.trf.xlu1 }
 0x2a6   :  { %v151_v22 = vmul.f32 %v111_v21, %v111_v21  ;;  %275 = vmatmul.msk.f32.vlgmr.msra.gmra.mxu2 %vm127_vm3, %v111_v21 }
 0x2a8   :  { %276 = vmatmul.msk.f32.vlgmr.msra.gmra.mxu3 %vm127_vm3, %v151_v22 }
 0x329   :  { %v148_v23 = vpop.f32.mrf.mxu2 }
 0x32a   :  { %v176_v24 = vmul.f32 0.125, %v148_v23 }
 0x32b   :  { %v173_v25 = vpop.f32.mrf.mxu3 }
 0x32c   :  { %v178_v26 = vmul.f32 %v176_v24, %v176_v24  ;;  %v177_v27 = vmul.f32 0.125, %v173_v25 }
 0x32e   :  { %v179_v28 = vsub.f32 %v177_v27, %v178_v26 }
 0x330   :  { %v180_v29 = vmax.f32 %v179_v28, 0.0 }
 0x332   :  { %v182_v30 = vadd.f32 1e-05, %v180_v29 }
 0x334   :  { %287 = vrsqrt.f32 %v182_v30  ;;  %vm189_vm5 = vweird.f32 %v182_v30 }
 0x33a   :  { %v288_v31 = vpop.eup %287 }
 0x33b   :  { %v184_v32 = vmul.f32 %v288_v31, %v182_v30  ;;  %vm190_vm4 = vweird.f32 %v288_v31 }
 0x33c   :  { %vm191_vm6 = vmor %vm189_vm5, %vm190_vm4 }
 0x33d   :  { %v185_v33 = vmul.f32 %v288_v31, %v184_v32 }
 0x33f   :  { %v186_v34 = vmul.f32 0.5, %v185_v33 }
 0x341   :  { %v187_v35 = vsub.f32 1.5, %v186_v34 }
 0x343   :  { %v188_v37 = vmul.f32 %v288_v31, %v187_v35 }
 0x345   :  { %v192_v38 = vsel %vm191_vm6, %v288_v31, %v188_v37 }
 0x346   :  { %v193_v39 = vmul.f32 %v192_v38, %v181_v36 }
 0x348   :  { %v195_v40 = vmul.f32 %v193_v39, %v176_v24  ;;  %277 = vmatpush.msk.msrb.mxu2 %vm208_vm7, %v193_v39 }
 0x349   :  { %278 = vmatmul.msk.f32.vlgmr.msrb.gmra.mxu2 %vm83_vm2, %v94_v20 }
 0x34a   :  { %v196_v42 = vsub.f32 %v194_v41, %v195_v40 }
 0x34c   :  { %v198_v43 = vsel %vm197_vm8, %v196_v42, 0.0 }
 0x34d   :  { %v199_v44 = vrot.slane %v198_v43, 4 }
 0x34f   :  { %v200_v45 = vadd.f32 %v199_v44, %v198_v43 }
 0x351   :  { %v201_v46 = vrot.slane %v200_v45, 2 }
 0x353   :  { %v202_v47 = vadd.f32 %v201_v46, %v200_v45 }
 0x355   :  { %v203_v48 = vrot.slane %v202_v47, 1 }
 0x357   :  { %v204_v50 = vadd.f32 %v203_v48, %v202_v47 }
 0x3cc   :  { %v229_v49 = vpop.f32.mrf.mxu2 }
 0x3cd   :  { %v232_v51 = vmul.f32 %v229_v49, %v379_v9 }
 0x3cf   :  { %v233_v52 = vadd.f32 %v232_v51, %v204_v50 }
 0x3d1   :  { %v234_v53 = vmul.f32 0.01, %v233_v52 }
 0x3d3   :  { %v235_v54 = vadd.f32 %v234_v53, %v379_v9 }
 0x3d5   :  { %v279_v55 = vmul.f32 -1.442695, %v235_v54 }
 0x3d7   :  { %289 = vpow2.f32 %v279_v55 }
 0x3dd   :  { %v290_v56 = vpop.eup %289 }
 0x3de   :  { %v239_v57 = vadd.f32 1.0, %v290_v56 }
 0x3e0   :  { %291 = vrcp.f32 %v239_v57  ;;  %v251_v61 = vand.u32 2147483648, %v239_v57  ;;  %v249_v63 = vand.u32 2147483647, %v239_v57  ;;  %vm245_vm10 = vweird.f32 %v239_v57 }
 0x3e2   :  { %v252_v1 = vor.u32 1.1754944e-38, %v251_v61  ;;  %vm250_vm12 = vcmp.eq.f32.partialorder %v249_v63, 8.507059e+37 }
 0x3e6   :  { %v292_v58 = vpop.eup %291 }
 0x3e7   :  { %v241_v59 = vmul.f32 %v292_v58, %v239_v57  ;;  %vm246_vm9 = vweird.f32 %v292_v58 }
 0x3e8   :  { %vm247_vm11 = vmor %vm245_vm10, %vm246_vm9 }
 0x3e9   :  { %v242_v60 = vsub.f32 1.0, %v241_v59 }
 0x3eb   :  { %v243_v62 = vmul.f32 %v292_v58, %v242_v60 }
 0x3ed   :  { %v244_v0 = vadd.f32 %v292_v58, %v243_v62 }
 0x3ef   :  { %v248_v2 = vsel %vm247_vm11, %v292_v58, %v244_v0 }
 0x3f0   :  { %v253_v3 = vsel %vm250_vm12, %v252_v1, %v248_v2 }
 0x3f1   :  { %v255_v4 = vmul.f32 %v253_v3, %v235_v54 }
 0x3f3   :  { %256 = vst.msk [vmem:[#allocation2] sm:$0xff] %vm59_vm1, %v255_v4 }
 0x3f4   :  { %267 = dma.vmem_to_hbm [thread:$0]  %s263_s5, 128, %s265_s15, [#allocation3]  }
 0x3f5   :  { %317 = dma.done.wait [#allocation3], 128  }
 0x3f6   :  { %318 = vsyncadd [#allocation3], 4294967168 }
 0x3f7   :  { %272 = vsyncpa [#allocation3], 1 }

</bundles_post_ra>
